<compile_context>
chip_gen: v5e
topology: v5e:2x2
jax: 0.10.0
libtpu: 0.0.40
codegen_flags: <defaults>
</compile_context>

<pallas_src>
import functools

import jax
import jax.numpy as jnp
from jax.experimental import pallas as pl
from jax.experimental.pallas import tpu as pltpu


def _round_up(n: int, m: int) -> int:
    return ((n + m - 1) // m) * m


def llama_mlp_kernel(x_ref, w1_ref, b1_ref, w2_ref, b2_ref, wp_ref, bp_ref,
                     o_ref, acc_ref):
    """Grid = (token tiles, intermediate tiles).

    x_ref  : (tm, Dp)   token tile (resident across the j axis)
    w1/w2  : (Dp, ti)   fc_1 / fc_2 weight slices (streamed over j)
    b1/b2  : (1, ti)    fc_1 / fc_2 bias slices (f32)
    wp     : (ti, Dp)   proj weight slice (streamed over j)
    bp     : (1, Dp)    proj bias (f32, added exactly once at finalize)
    o_ref  : (tm, Dp)   output tile (written only at j == last)
    acc_ref: (tm, Dp)   f32 accumulator scratch
    """
    j = pl.program_id(1)

    @pl.when(j == 0)
    def _init():
        acc_ref[...] = jnp.zeros_like(acc_ref)

    x = x_ref[...]
    # fc_1 / fc_2 for this I-slice (MXU, f32 accumulation).
    gate = jnp.dot(x, w1_ref[...], preferred_element_type=jnp.float32) + b1_ref[...]
    up = jnp.dot(x, w2_ref[...], preferred_element_type=jnp.float32) + b2_ref[...]
    # SiLU(gate) * up  (sigmoid runs on the EUP, elementwise per I-slice).
    h = (gate * jax.nn.sigmoid(gate)) * up
    # Partial projection contribution of this I-slice.
    acc_ref[...] += jnp.dot(h.astype(wp_ref.dtype), wp_ref[...],
                            preferred_element_type=jnp.float32)

    @pl.when(j == pl.num_programs(1) - 1)
    def _finalize():
        # proj bias added exactly once per token tile.
        o_ref[...] = (acc_ref[...] + bp_ref[...]).astype(o_ref.dtype)


@functools.partial(jax.jit, static_argnames=("tm", "ti"))
def llama_mlp(x, w1, b1, w2, b2, wp, bp, *, tm=256, ti=512):
    """x: [B, T, D] -> [B, T, D].  Weights pre-transposed: w1/w2 [D, I], wp [I, D]."""
    B, T, D = x.shape
    I = w1.shape[1]
    M = B * T

    # Lane-dense / tiling-friendly padded sizes.
    Dp = _round_up(D, 128)
    tm_eff = min(tm, _round_up(M, 8))
    Mp = _round_up(M, tm_eff)
    ti_eff = min(ti, _round_up(I, 128))
    Ip = _round_up(I, ti_eff)

    def pad2(a, r, c):
        return jnp.pad(a, ((0, r - a.shape[0]), (0, c - a.shape[1])))

    xf = pad2(x.reshape(M, D), Mp, Dp)
    w1p = pad2(w1, Dp, Ip)
    w2p = pad2(w2, Dp, Ip)
    wpp = pad2(wp, Ip, Dp)
    # Biases kept in f32 (tiny); padded lanes are zero so they are inert.
    b1p = jnp.pad(b1.astype(jnp.float32), (0, Ip - I)).reshape(1, Ip)
    b2p = jnp.pad(b2.astype(jnp.float32), (0, Ip - I)).reshape(1, Ip)
    bpp = jnp.pad(bp.astype(jnp.float32), (0, Dp - D)).reshape(1, Dp)

    grid = (Mp // tm_eff, Ip // ti_eff)

    itemsize = jnp.dtype(x.dtype).itemsize
    cost = pl.CostEstimate(
        flops=6 * M * D * I,
        transcendentals=M * I,
        bytes_accessed=(2 * Mp * Dp) * itemsize
        + (2 * Dp * Ip + Ip * Dp) * itemsize * grid[0],
    )

    out = pl.pallas_call(
        llama_mlp_kernel,
        out_shape=jax.ShapeDtypeStruct((Mp, Dp), x.dtype),
        grid_spec=pltpu.PrefetchScalarGridSpec(
            num_scalar_prefetch=0,
            grid=grid,
            in_specs=[
                pl.BlockSpec((tm_eff, Dp), lambda i, j: (i, 0)),   # x tile
                pl.BlockSpec((Dp, ti_eff), lambda i, j: (0, j)),   # w1 slice
                pl.BlockSpec((1, ti_eff), lambda i, j: (0, j)),    # b1 slice
                pl.BlockSpec((Dp, ti_eff), lambda i, j: (0, j)),   # w2 slice
                pl.BlockSpec((1, ti_eff), lambda i, j: (0, j)),    # b2 slice
                pl.BlockSpec((ti_eff, Dp), lambda i, j: (j, 0)),   # wp slice
                pl.BlockSpec((1, Dp), lambda i, j: (0, 0)),        # bp
            ],
            out_specs=pl.BlockSpec((tm_eff, Dp), lambda i, j: (i, 0)),
            scratch_shapes=[pltpu.VMEM((tm_eff, Dp), jnp.float32)],
        ),
        compiler_params=pltpu.CompilerParams(
            dimension_semantics=("parallel", "arbitrary"),
            vmem_limit_bytes=64 * 1024 * 1024,
        ),
        cost_estimate=cost,
    )(xf, w1p, b1p, w2p, b2p, wpp, bpp)

    return out[:M, :D].reshape(B, T, D)


def _reference_mlp(x, w1, b1, w2, b2, wp, bp):
    """Plain-JAX reference matching the PyTorch forward."""
    g = x @ w1 + b1
    u = x @ w2 + b2
    h = jax.nn.silu(g) * u
    return h @ wp + bp


if __name__ == "__main__":
    # Toy config: n_embd=32, intermediate_size=64, bias=True, batch=2, seq=8.
    B, T, D, I = 2, 8, 32, 64
    key = jax.random.PRNGKey(0)
    kx, k1, kb1, k2, kb2, kp, kbp = jax.random.split(key, 7)

    def uinit(k, shape, fan_in):
        lim = 1.0 / jnp.sqrt(jnp.float32(fan_in))
        return jax.random.uniform(k, shape, jnp.float32, -lim, lim)

    x = jax.random.normal(kx, (B, T, D), jnp.float32)
    # Stored pre-transposed: [in, out]
    w1 = uinit(k1, (D, I), D)
    b1 = uinit(kb1, (I,), D)
    w2 = uinit(k2, (D, I), D)
    b2 = uinit(kb2, (I,), D)
    wp = uinit(kp, (I, D), I)
    bp = uinit(kbp, (D,), I)

    # --- f32 path: tight numerical check -------------------------------------
    out = jax.block_until_ready(llama_mlp(x, w1, b1, w2, b2, wp, bp))
    ref = _reference_mlp(x, w1, b1, w2, b2, wp, bp)
    assert out.shape == (B, T, D)
    assert jnp.allclose(out, ref, atol=1e-5, rtol=1e-5), "f32 mismatch vs reference"

    # --- ragged token count: exercises M padding (no divisibility assert) ----
    xr = x[:1, :5]
    out_r = jax.block_until_ready(llama_mlp(xr, w1, b1, w2, b2, wp, bp))
    ref_r = _reference_mlp(xr, w1, b1, w2, b2, wp, bp)
    assert out_r.shape == (1, 5, D)
    assert jnp.allclose(out_r, ref_r, atol=1e-5, rtol=1e-5), "ragged mismatch"

    # --- bf16 hot path (bf16 MXU matmuls, f32 accumulation) ------------------
    xb = x.astype(jnp.bfloat16)
    w1b, w2b, wpb = (w.astype(jnp.bfloat16) for w in (w1, w2, wp))
    out_b = jax.block_until_ready(llama_mlp(xb, w1b, b1, w2b, b2, wpb, bp))
    ref_b = _reference_mlp(
        xb.astype(jnp.float32), w1b.astype(jnp.float32), b1,
        w2b.astype(jnp.float32), b2, wpb.astype(jnp.float32), bp)
    assert out_b.shape == (B, T, D)
    assert jnp.allclose(out_b.astype(jnp.float32), ref_b, atol=5e-2, rtol=5e-2), \
        "bf16 mismatch vs reference"

    print("KERNEL_OK")
</pallas_src>

<mosaic_0001>
module attributes {stable_mosaic.version = 11 : i64} {
  func.func @llama_mlp_kernel(%arg0: i32, %arg1: i32, %arg2: memref<16x128xf32, #tpu.memory_space<vmem>>, %arg3: memref<128x128xf32, #tpu.memory_space<vmem>>, %arg4: memref<1x128xf32, #tpu.memory_space<vmem>>, %arg5: memref<128x128xf32, #tpu.memory_space<vmem>>, %arg6: memref<1x128xf32, #tpu.memory_space<vmem>>, %arg7: memref<128x128xf32, #tpu.memory_space<vmem>>, %arg8: memref<1x128xf32, #tpu.memory_space<vmem>>, %arg9: memref<16x128xf32, #tpu.memory_space<vmem>>, %arg10: memref<16x128xf32, #tpu.memory_space<vmem>>) attributes {dimension_semantics = [#tpu.dimension_semantics<parallel>, #tpu.dimension_semantics<arbitrary>], iteration_bounds = array<i64: 1, 1>, scalar_prefetch = 0 : i64, scratch_operands = 1 : i64, tpu.core_type = #tpu.core_type<tc>, window_params = [{transform_indices = @transform_0, window_bounds = array<i64: 16, 128>}, {transform_indices = @transform_1, window_bounds = array<i64: 128, 128>}, {transform_indices = @transform_2, window_bounds = array<i64: 1, 128>}, {transform_indices = @transform_3, window_bounds = array<i64: 128, 128>}, {transform_indices = @transform_4, window_bounds = array<i64: 1, 128>}, {transform_indices = @transform_5, window_bounds = array<i64: 128, 128>}, {pipeline_mode = #tpu.pipeline_mode<synchronous>, transform_indices = @transform_6, window_bounds = array<i64: 1, 128>}, {transform_indices = @transform_7, window_bounds = array<i64: 16, 128>}]} {
    %c0_i32 = arith.constant 0 : i32
    %0 = arith.cmpi eq, %arg1, %c0_i32 : i32
    %1 = arith.extui %0 : i1 to i32
    %c0_i32_0 = arith.constant 0 : i32
    %2 = arith.cmpi ne, %1, %c0_i32_0 : i32
    scf.if %2 {
      %cst_21 = arith.constant 0.000000e+00 : f32
      %29 = vector.broadcast %cst_21 : f32 to vector<16x128xf32>
      %c0_22 = arith.constant 0 : index
      %c0_23 = arith.constant 0 : index
      %30 = vector.load %arg10[%c0_22, %c0_23] : memref<16x128xf32, #tpu.memory_space<vmem>>, vector<16x128xf32>
      tpu.vector_store %arg10[%c0_22, %c0_23], %29 {strides = array<i32>} : memref<16x128xf32, #tpu.memory_space<vmem>>, vector<16x128xf32>,
    } else {
    }
    %c0 = arith.constant 0 : index
    %c0_1 = arith.constant 0 : index
    %3 = vector.load %arg2[%c0, %c0_1] : memref<16x128xf32, #tpu.memory_space<vmem>>, vector<16x128xf32>
    %c0_2 = arith.constant 0 : index
    %c0_3 = arith.constant 0 : index
    %4 = vector.load %arg3[%c0_2, %c0_3] : memref<128x128xf32, #tpu.memory_space<vmem>>, vector<128x128xf32>
    %cst = arith.constant dense<0.000000e+00> : vector<16x128xf32>
    %5 = tpu.matmul %3, %4, %cst {dimension_numbers = #tpu.dot_dimension_numbers<[1], [0], [0], [1], [0, 0, 1, 1], [], []>} : vector<16x128xf32>, vector<128x128xf32>, vector<16x128xf32> -> vector<16x128xf32>
    %c0_4 = arith.constant 0 : index
    %c0_5 = arith.constant 0 : index
    %6 = vector.load %arg4[%c0_4, %c0_5] : memref<1x128xf32, #tpu.memory_space<vmem>>, vector<1x128xf32>
    %7 = vector.broadcast %6 : vector<1x128xf32> to vector<16x128xf32>
    %8 = arith.addf %5, %7 : vector<16x128xf32>
    %c0_6 = arith.constant 0 : index
    %c0_7 = arith.constant 0 : index
    %9 = vector.load %arg5[%c0_6, %c0_7] : memref<128x128xf32, #tpu.memory_space<vmem>>, vector<128x128xf32>
    %cst_8 = arith.constant dense<0.000000e+00> : vector<16x128xf32>
    %10 = tpu.matmul %3, %9, %cst_8 {dimension_numbers = #tpu.dot_dimension_numbers<[1], [0], [0], [1], [0, 0, 1, 1], [], []>} : vector<16x128xf32>, vector<128x128xf32>, vector<16x128xf32> -> vector<16x128xf32>
    %c0_9 = arith.constant 0 : index
    %c0_10 = arith.constant 0 : index
    %11 = vector.load %arg6[%c0_9, %c0_10] : memref<1x128xf32, #tpu.memory_space<vmem>>, vector<1x128xf32>
    %12 = vector.broadcast %11 : vector<1x128xf32> to vector<16x128xf32>
    %13 = arith.addf %10, %12 : vector<16x128xf32>
    %14 = arith.negf %8 : vector<16x128xf32>
    %15 = math.exp %14 : vector<16x128xf32>
    %cst_11 = arith.constant 1.000000e+00 : f32
    %16 = vector.broadcast %cst_11 : f32 to vector<16x128xf32>
    %17 = arith.addf %16, %15 : vector<16x128xf32>
    %18 = arith.divf %16, %17 : vector<16x128xf32>
    %19 = arith.mulf %8, %18 : vector<16x128xf32>
    %20 = arith.mulf %19, %13 : vector<16x128xf32>
    %c0_12 = arith.constant 0 : index
    %c0_13 = arith.constant 0 : index
    %21 = vector.load %arg10[%c0_12, %c0_13] : memref<16x128xf32, #tpu.memory_space<vmem>>, vector<16x128xf32>
    %c0_14 = arith.constant 0 : index
    %c0_15 = arith.constant 0 : index
    %22 = vector.load %arg7[%c0_14, %c0_15] : memref<128x128xf32, #tpu.memory_space<vmem>>, vector<128x128xf32>
    %cst_16 = arith.constant dense<0.000000e+00> : vector<16x128xf32>
    %23 = tpu.matmul %20, %22, %cst_16 {dimension_numbers = #tpu.dot_dimension_numbers<[1], [0], [0], [1], [0, 0, 1, 1], [], []>} : vector<16x128xf32>, vector<128x128xf32>, vector<16x128xf32> -> vector<16x128xf32>
    %24 = arith.addf %21, %23 : vector<16x128xf32>
    %c0_17 = arith.constant 0 : index
    %c0_18 = arith.constant 0 : index
    %25 = vector.load %arg10[%c0_17, %c0_18] : memref<16x128xf32, #tpu.memory_space<vmem>>, vector<16x128xf32>
    tpu.vector_store %arg10[%c0_17, %c0_18], %24 {strides = array<i32>} : memref<16x128xf32, #tpu.memory_space<vmem>>, vector<16x128xf32>,
    %c0_i32_19 = arith.constant 0 : i32
    %26 = arith.cmpi eq, %arg1, %c0_i32_19 : i32
    %27 = arith.extui %26 : i1 to i32
    %c0_i32_20 = arith.constant 0 : i32
    %28 = arith.cmpi ne, %27, %c0_i32_20 : i32
    scf.if %28 {
      %c0_21 = arith.constant 0 : index
      %c0_22 = arith.constant 0 : index
      %29 = vector.load %arg10[%c0_21, %c0_22] : memref<16x128xf32, #tpu.memory_space<vmem>>, vector<16x128xf32>
      %c0_23 = arith.constant 0 : index
      %c0_24 = arith.constant 0 : index
      %30 = vector.load %arg8[%c0_23, %c0_24] : memref<1x128xf32, #tpu.memory_space<vmem>>, vector<1x128xf32>
      %31 = vector.broadcast %30 : vector<1x128xf32> to vector<16x128xf32>
      %32 = arith.addf %29, %31 : vector<16x128xf32>
      %c0_25 = arith.constant 0 : index
      %c0_26 = arith.constant 0 : index
      %33 = vector.load %arg9[%c0_25, %c0_26] : memref<16x128xf32, #tpu.memory_space<vmem>>, vector<16x128xf32>
      tpu.vector_store %arg9[%c0_25, %c0_26], %32 {strides = array<i32>} : memref<16x128xf32, #tpu.memory_space<vmem>>, vector<16x128xf32>,
    } else {
    }
    return
  }
  func.func @transform_0(%arg0: i32, %arg1: i32) -> (i32, i32) {
    %c0_i32 = arith.constant 0 : i32
    %c0_i32_0 = arith.constant 0 : i32
    return %arg0, %c0_i32 : i32, i32
  }
  func.func @transform_1(%arg0: i32, %arg1: i32) -> (i32, i32) {
    %c0_i32 = arith.constant 0 : i32
    %c0_i32_0 = arith.constant 0 : i32
    return %c0_i32, %arg1 : i32, i32
  }
  func.func @transform_2(%arg0: i32, %arg1: i32) -> (i32, i32) {
    %c0_i32 = arith.constant 0 : i32
    %c0_i32_0 = arith.constant 0 : i32
    return %c0_i32, %arg1 : i32, i32
  }
  func.func @transform_3(%arg0: i32, %arg1: i32) -> (i32, i32) {
    %c0_i32 = arith.constant 0 : i32
    %c0_i32_0 = arith.constant 0 : i32
    return %c0_i32, %arg1 : i32, i32
  }
  func.func @transform_4(%arg0: i32, %arg1: i32) -> (i32, i32) {
    %c0_i32 = arith.constant 0 : i32
    %c0_i32_0 = arith.constant 0 : i32
    return %c0_i32, %arg1 : i32, i32
  }
  func.func @transform_5(%arg0: i32, %arg1: i32) -> (i32, i32) {
    %c0_i32 = arith.constant 0 : i32
    %c0_i32_0 = arith.constant 0 : i32
    return %arg1, %c0_i32 : i32, i32
  }
  func.func @transform_6(%arg0: i32, %arg1: i32) -> (i32, i32) {
    %c0_i32 = arith.constant 0 : i32
    %c0_i32_0 = arith.constant 0 : i32
    %c0_i32_1 = arith.constant 0 : i32
    return %c0_i32, %c0_i32_0 : i32, i32
  }
  func.func @transform_7(%arg0: i32, %arg1: i32) -> (i32, i32) {
    %c0_i32 = arith.constant 0 : i32
    %c0_i32_0 = arith.constant 0 : i32
    return %arg0, %c0_i32 : i32, i32
  }
}

</mosaic_0001>

<bundles_post_ra>
// kernel: llama_mlp.1
= control target key start
LH: loop header
LB: loop body
LE: loop exit
PB: predicated region body
PF: predicated region fallthrough
CT: control target
= control target key end

     0   :  { %s458_s1 = inlined_call_operand.vmem [shape: f32[128,128], index: 1, kind: input, shape index: {}]   ;;  %s459_s3 = inlined_call_operand.vmem [shape: f32[128,128], index: 3, kind: input, shape index: {}]   ;;  %s460_s2 = inlined_call_operand.vmem [shape: f32[1,128], index: 2, kind: input, shape index: {}]   ;;  %s461_s0 = inlined_call_operand.vmem [shape: f32[16,128], index: 0, kind: input, shape index: {}]   ;;  %s462_s4 = inlined_call_operand.vmem [shape: f32[1,128], index: 4, kind: input, shape index: {}]   ;;  %s463_s6 = inlined_call_operand.vmem [shape: f32[1,128], index: 6, kind: input, shape index: {}]   ;;  %s464_s5 = inlined_call_operand.vmem [shape: f32[128,128], index: 5, kind: input, shape index: {}]   ;;  %s465_s7 = inlined_call_operand.vmem [shape: f32[16,128], index: 7, kind: output, shape index: {}]  }
   0x1   :  { %v49_v0 = vld [vmem:[%s458_s1 + $0x78] sm:$0xff]  ;;  %v48_v1 = vld [vmem:[%s458_s1 + $0x70] sm:$0xff]  ;;  %v47_v2 = vld [vmem:[%s458_s1 + $0x68] sm:$0xff] }
   0x2   :  { %54 = vmatpush.msra.mxu0 %v49_v0  ;;  %226 = vmatpush.msra.mxu3 %v49_v0  ;;  %v46_v3 = vld [vmem:[%s458_s1 + $0x60] sm:$0xff]  ;;  %v92_v4 = vld [vmem:[%s459_s3 + $0x78] sm:$0xff]  ;;  %v91_v5 = vld [vmem:[%s459_s3 + $0x70] sm:$0xff] }
   0x3   :  { %v45_v6 = vld [vmem:[%s458_s1 + $0x58] sm:$0xff]  ;;  %97 = vmatpush.msra.mxu1 %v92_v4  ;;  %v90_v7 = vld [vmem:[%s459_s3 + $0x68] sm:$0xff]  ;;  %v44_v8 = vld [vmem:[%s458_s1 + $0x50] sm:$0xff] }
   0x4   :  { %55 = vmatpush.msra.mxu0 %v48_v1  ;;  %227 = vmatpush.msra.mxu3 %v48_v1  ;;  %v89_v9 = vld [vmem:[%s459_s3 + $0x60] sm:$0xff]  ;;  %v43_v10 = vld [vmem:[%s458_s1 + $0x48] sm:$0xff]  ;;  %v88_v11 = vld [vmem:[%s459_s3 + $0x58] sm:$0xff] }
   0x5   :  { %98 = vmatpush.msra.mxu1 %v91_v5  ;;  %v42_v12 = vld [vmem:[%s458_s1 + $0x40] sm:$0xff]  ;;  %v87_v13 = vld [vmem:[%s459_s3 + $0x50] sm:$0xff]  ;;  %v41_v14 = vld [vmem:[%s458_s1 + $0x38] sm:$0xff] }
   0x6   :  { %56 = vmatpush.msra.mxu0 %v47_v2  ;;  %228 = vmatpush.msra.mxu3 %v47_v2  ;;  %v86_v15 = vld [vmem:[%s459_s3 + $0x48] sm:$0xff]  ;;  %v40_v16 = vld [vmem:[%s458_s1 + $0x30] sm:$0xff]  ;;  %v85_v17 = vld [vmem:[%s459_s3 + $0x40] sm:$0xff] }
   0x7   :  { %99 = vmatpush.msra.mxu1 %v90_v7  ;;  %v39_v18 = vld [vmem:[%s458_s1 + $0x28] sm:$0xff]  ;;  %v84_v19 = vld [vmem:[%s459_s3 + $0x38] sm:$0xff]  ;;  %v38_v20 = vld [vmem:[%s458_s1 + $0x20] sm:$0xff] }
   0x8   :  { %57 = vmatpush.msra.mxu0 %v46_v3  ;;  %229 = vmatpush.msra.mxu3 %v46_v3  ;;  %v83_v21 = vld [vmem:[%s459_s3 + $0x30] sm:$0xff]  ;;  %v37_v22 = vld [vmem:[%s458_s1 + $0x18] sm:$0xff]  ;;  %v82_v23 = vld [vmem:[%s459_s3 + $0x28] sm:$0xff] }
   0x9   :  { %100 = vmatpush.msra.mxu1 %v89_v9  ;;  %v36_v24 = vld [vmem:[%s458_s1 + $0x10] sm:$0xff]  ;;  %v81_v25 = vld [vmem:[%s459_s3 + $0x20] sm:$0xff]  ;;  %v35_v26 = vld [vmem:[%s458_s1 + $0x8] sm:$0xff] }
   0xa   :  { %58 = vmatpush.msra.mxu0 %v45_v6  ;;  %230 = vmatpush.msra.mxu3 %v45_v6  ;;  %v80_v27 = vld [vmem:[%s459_s3 + $0x18] sm:$0xff]  ;;  %v34_v28 = vld [vmem:[%s458_s1] sm:$0xff]  ;;  %v33_v30 = vld [vmem:[%s461_s0 + $0x8] sm:$0xff] }
   0xb   :  { %101 = vmatpush.msra.mxu1 %v88_v11  ;;  %v32_v29 = vld [vmem:[%s461_s0] sm:$0xff]  ;;  %v79_v31 = vld [vmem:[%s459_s3 + $0x10] sm:$0xff]  ;;  %v78_v32 = vld [vmem:[%s459_s3 + $0x8] sm:$0xff] }
   0xc   :  { %59 = vmatpush.msra.mxu0 %v44_v8  ;;  %231 = vmatpush.msra.mxu3 %v44_v8  ;;  %v77_v33 = vld [vmem:[%s459_s3] sm:$0xff]  ;;  %v179_v34 = vld [vmem:[%s464_s5 + $0x78] sm:$0xff]  ;;  %v178_v35 = vld [vmem:[%s464_s5 + $0x70] sm:$0xff] }
   0xd   :  { %102 = vmatpush.msra.mxu1 %v87_v13  ;;  %180 = vmatpush.msra.mxu2 %v179_v34  ;;  %v177_v36 = vld [vmem:[%s464_s5 + $0x68] sm:$0xff]  ;;  %v176_v37 = vld [vmem:[%s464_s5 + $0x60] sm:$0xff]  ;;  %v175_v38 = vld [vmem:[%s464_s5 + $0x58] sm:$0xff] }
   0xe   :  { %60 = vmatpush.msra.mxu0 %v43_v10  ;;  %232 = vmatpush.msra.mxu3 %v43_v10  ;;  %v174_v39 = vld [vmem:[%s464_s5 + $0x50] sm:$0xff]  ;;  %v173_v40 = vld [vmem:[%s464_s5 + $0x48] sm:$0xff]  ;;  %v172_v41 = vld [vmem:[%s464_s5 + $0x40] sm:$0xff] }
   0xf   :  { %103 = vmatpush.msra.mxu1 %v86_v15  ;;  %181 = vmatpush.msra.mxu2 %v178_v35  ;;  %v171_v42 = vld [vmem:[%s464_s5 + $0x38] sm:$0xff]  ;;  %v170_v43 = vld [vmem:[%s464_s5 + $0x30] sm:$0xff]  ;;  %v169_v44 = vld [vmem:[%s464_s5 + $0x28] sm:$0xff] }
  0x10   :  { %61 = vmatpush.msra.mxu0 %v42_v12  ;;  %233 = vmatpush.msra.mxu3 %v42_v12  ;;  %v168_v45 = vld [vmem:[%s464_s5 + $0x20] sm:$0xff]  ;;  %v167_v46 = vld [vmem:[%s464_s5 + $0x18] sm:$0xff]  ;;  %v166_v48 = vld [vmem:[%s464_s5 + $0x10] sm:$0xff] }
  0x11   :  { %104 = vmatpush.msra.mxu1 %v85_v17  ;;  %182 = vmatpush.msra.mxu2 %v177_v36  ;;  %v242_v47 = vld [vmem:[%s460_s2] ss:$0 sm:$0xff]  ;;  %v165_v49 = vld [vmem:[%s464_s5 + $0x8] sm:$0xff] }
  0x12   :  { %62 = vmatpush.msra.mxu0 %v41_v14  ;;  %234 = vmatpush.msra.mxu3 %v41_v14  ;;  %v164_v52 = vld [vmem:[%s464_s5] sm:$0xff] }
  0x13   :  { %105 = vmatpush.msra.mxu1 %v84_v19  ;;  %183 = vmatpush.msra.mxu2 %v176_v37  ;;  %v243_v4 = vld [vmem:[%s462_s4] ss:$0 sm:$0xff] }
  0x14   :  { %63 = vmatpush.msra.mxu0 %v40_v16  ;;  %235 = vmatpush.msra.mxu3 %v40_v16 }
  0x15   :  { %106 = vmatpush.msra.mxu1 %v83_v21  ;;  %184 = vmatpush.msra.mxu2 %v175_v38 }
  0x16   :  { %64 = vmatpush.msra.mxu0 %v39_v18  ;;  %236 = vmatpush.msra.mxu3 %v39_v18 }
  0x17   :  { %107 = vmatpush.msra.mxu1 %v82_v23  ;;  %185 = vmatpush.msra.mxu2 %v174_v39 }
  0x18   :  { %65 = vmatpush.msra.mxu0 %v38_v20  ;;  %237 = vmatpush.msra.mxu3 %v38_v20 }
  0x19   :  { %108 = vmatpush.msra.mxu1 %v81_v25  ;;  %186 = vmatpush.msra.mxu2 %v173_v40 }
  0x1a   :  { %66 = vmatpush.msra.mxu0 %v37_v22  ;;  %238 = vmatpush.msra.mxu3 %v37_v22 }
  0x1b   :  { %109 = vmatpush.msra.mxu1 %v80_v27  ;;  %187 = vmatpush.msra.mxu2 %v172_v41 }
  0x1c   :  { %67 = vmatpush.msra.mxu0 %v36_v24  ;;  %239 = vmatpush.msra.mxu3 %v36_v24 }
  0x1d   :  { %110 = vmatpush.msra.mxu1 %v79_v31  ;;  %188 = vmatpush.msra.mxu2 %v171_v42 }
  0x1e   :  { %68 = vmatpush.msra.mxu0 %v35_v26  ;;  %240 = vmatpush.msra.mxu3 %v35_v26  ;;  %v244_v26 = vld [vmem:[%s463_s6] ss:$0 sm:$0xff] }
  0x1f   :  { %111 = vmatpush.msra.mxu1 %v78_v32  ;;  %189 = vmatpush.msra.mxu2 %v170_v43 }
  0x20   :  { %69 = vmatpush.msra.mxu0 %v34_v28  ;;  %241 = vmatpush.msra.mxu3 %v34_v28 }
  0x21   :  { %70 = vmatmul.f32.vlgmr.msra.gmra.mxu0 %v32_v29  ;;  %73 = vmatmul.f32.vlgmr.msra.gmra.mxu3 %v33_v30 }
  0x22   :  { %112 = vmatpush.msra.mxu1 %v77_v33  ;;  %190 = vmatpush.msra.mxu2 %v169_v44 }
  0x23   :  { %113 = vmatmul.f32.vlgmr.msra.gmra.mxu1 %v32_v29 }
  0x24   :  { %191 = vmatpush.msra.mxu2 %v168_v45 }
  0x26   :  { %192 = vmatpush.msra.mxu2 %v167_v46 }
  0x28   :  { %193 = vmatpush.msra.mxu2 %v166_v48 }
  0x2a   :  { %194 = vmatpush.msra.mxu2 %v165_v49 }
  0x2b   :  { %116 = vmatmul.f32.gmra.mxu1 %v33_v30 }
  0x2c   :  { %195 = vmatpush.msra.mxu2 %v164_v52 }
  0x9e   :  { %v71_v50 = vpop.f32.mrf.mxu0 }
  0x9f   :  { %v72_v51 = vadd.f32 %v242_v47, %v71_v50 }
  0xa0   :  { %v114_v1 = vpop.f32.mrf.mxu1 }
  0xa1   :  { %v224_v53 = vmul.f32 -1.442695, %v72_v51  ;;  %v115_v11 = vadd.f32 %v243_v4, %v114_v1 }
  0xa3   :  { %245 = vpow2.f32 %v224_v53 }
  0xa4   :  { %v74_v54 = vpop.f32.mrf.mxu3 }
  0xa5   :  { %v75_v55 = vadd.f32 %v242_v47, %v74_v54 }
  0xa7   :  { %v225_v56 = vmul.f32 -1.442695, %v75_v55 }
  0xa8   :  { %v117_v20 = vpop.f32.mrf.mxu1 }
  0xa9   :  { %v246_v57 = vpop.eup %245  ;;  %247 = vpow2.f32 %v225_v56  ;;  %v118_v24 = vadd.f32 %v243_v4, %v117_v20 }
  0xaa   :  { %v126_v58 = vadd.f32 1.0, %v246_v57 }
  0xac   :  { %249 = vrcp.f32 %v126_v58  ;;  %v139_v0 = vand.u32 2147483648, %v126_v58  ;;  %v137_v3 = vand.u32 2147483647, %v126_v58  ;;  %vm133_vm1 = vweird.f32 %v126_v58 }
  0xae   :  { %v140_v8 = vor.u32 1.1754944e-38, %v139_v0  ;;  %vm138_vm3 = vcmp.eq.f32.partialorder %v137_v3, 8.507059e+37 }
  0xaf   :  { %v248_v59 = vpop.eup %247 }
  0xb0   :  { %v127_v60 = vadd.f32 1.0, %v248_v59 }
  0xb2   :  { %v250_v61 = vpop.eup %249  ;;  %251 = vrcp.f32 %v127_v60  ;;  %v154_v13 = vand.u32 2147483648, %v127_v60  ;;  %v152_v16 = vand.u32 2147483647, %v127_v60  ;;  %vm148_vm5 = vweird.f32 %v127_v60 }
  0xb3   :  { %v129_v62 = vmul.f32 %v250_v61, %v126_v58  ;;  %vm134_vm0 = vweird.f32 %v250_v61 }
  0xb4   :  { %vm135_vm2 = vmor %vm133_vm1, %vm134_vm0  ;;  %v155_v19 = vor.u32 1.1754944e-38, %v154_v13  ;;  %vm153_vm7 = vcmp.eq.f32.partialorder %v152_v16, 8.507059e+37 }
  0xb5   :  { %v130_v63 = vsub.f32 1.0, %v129_v62 }
  0xb7   :  { %v131_v2 = vmul.f32 %v250_v61, %v130_v63 }
  0xb8   :  { %v252_v5 = vpop.eup %251 }
  0xb9   :  { %v132_v6 = vadd.f32 %v250_v61, %v131_v2  ;;  %v144_v7 = vmul.f32 %v252_v5, %v127_v60  ;;  %vm149_vm4 = vweird.f32 %v252_v5 }
  0xba   :  { %vm150_vm6 = vmor %vm148_vm5, %vm149_vm4 }
  0xbb   :  { %v136_v9 = vsel %vm135_vm2, %v250_v61, %v132_v6  ;;  %v145_v10 = vsub.f32 1.0, %v144_v7 }
  0xbc   :  { %v141_v12 = vsel %vm138_vm3, %v140_v8, %v136_v9 }
  0xbd   :  { %v158_v14 = vmul.f32 %v141_v12, %v72_v51  ;;  %v146_v15 = vmul.f32 %v252_v5, %v145_v10 }
  0xbf   :  { %v147_v17 = vadd.f32 %v252_v5, %v146_v15  ;;  %v160_v18 = vmul.f32 %v158_v14, %v115_v11 }
  0xc1   :  { %v151_v21 = vsel %vm150_vm6, %v252_v5, %v147_v17  ;;  %196 = vmatmul.f32.vlgmr.msra.gmra.mxu2 %v160_v18 }
  0xc2   :  { %v156_v22 = vsel %vm153_vm7, %v155_v19, %v151_v21 }
  0xc3   :  { %v159_v23 = vmul.f32 %v156_v22, %v75_v55 }
  0xc5   :  { %v161_v25 = vmul.f32 %v159_v23, %v118_v24 }
  0xc9   :  { %199 = vmatmul.f32.gmra.mxu2 %v161_v25 }
 0x144   :  { %v197_v27 = vpop.f32.mrf.mxu2 }
 0x145   :  { %v216_v28 = vadd.f32 %v244_v26, %v197_v27 }
 0x147   :  { %218 = vst [vmem:[%s465_s7] sm:$0xff] %v216_v28 }
 0x14c   :  { %v200_v29 = vpop.f32.mrf.mxu2 }
 0x14d   :  { %v217_v30 = vadd.f32 %v244_v26, %v200_v29 }
 0x14f   :  { %219 = vst [vmem:[%s465_s7 + $0x8] sm:$0xff] %v217_v30 }

</bundles_post_ra>
